<compile_context>
chip_gen: v5e
topology: v5e:2x2
jax: 0.10.0
libtpu: 0.0.40
codegen_flags: <defaults>
</compile_context>

<pallas_src>
import math

import jax
import jax.numpy as jnp
from jax.experimental import pallas as pl
from jax.experimental.pallas import tpu as pltpu

STATE_DIM = 8
ACTION_DIM = 4
HIDDEN_DIM = 32
BATCH = 8

LOG_SQRT_2PI = 0.5 * math.log(2.0 * math.pi)
ACTION_SCALE = 2.0 * math.pi  # self.action_scale = torch.tensor(2 * np.pi)
LANES = 128


def _round_up(x, m):
    return ((x + m - 1) // m) * m


def _choose_tiling(batch):
    """Return (padded_batch, row_tile).

    Tile is a multiple of 8, capped at 1024 (per-step overhead amortization,
    still far under scoped VMEM on all generations), and chosen so the grid has
    >=2 steps whenever the batch allows it (v7x megacore sharding). Ragged
    batches are padded up to a tile multiple instead of one giant tile.
    """
    cap = 1024
    b8 = max(8, _round_up(batch, 8))
    if b8 <= 16:
        return b8, b8
    bt = min(cap, _round_up((b8 + 1) // 2, 8))
    return _round_up(b8, bt), bt


# -----------------------------------------------------------------------------
# Parameter init (PyTorch-style U(-1/sqrt(fan_in), 1/sqrt(fan_in)), weights
# stored [in, out] i.e. transposed vs nn.Linear.weight).
# -----------------------------------------------------------------------------
def init_params(key, state_dim, action_dim, hidden_dim):
    def linear(k, fan_in, fan_out):
        kw, kb = jax.random.split(k)
        bound = 1.0 / math.sqrt(fan_in)
        w = jax.random.uniform(kw, (fan_in, fan_out), jnp.float32, -bound, bound)
        b = jax.random.uniform(kb, (fan_out,), jnp.float32, -bound, bound)
        return w, b

    keys = jax.random.split(key, 6)
    aw1, ab1 = linear(keys[0], state_dim, hidden_dim)
    aw2, ab2 = linear(keys[1], hidden_dim, hidden_dim)
    aw3, ab3 = linear(keys[2], hidden_dim, action_dim)
    cw1, cb1 = linear(keys[3], state_dim, hidden_dim)
    cw2, cb2 = linear(keys[4], hidden_dim, hidden_dim)
    cw3, cb3 = linear(keys[5], hidden_dim, 1)
    action_std = jnp.full((action_dim,), 0.5, jnp.float32)  # nn.Parameter(ones*0.5)
    return (aw1, ab1, aw2, ab2, aw3, ab3,
            cw1, cb1, cw2, cb2, cw3, cb3, action_std)


# -----------------------------------------------------------------------------
# Host-side packing: fuse actor|critic into block matrices, precompute the
# std-derived rows, selector matrix and entropy, concatenate into one [R, 128]
# f32 buffer addressed with static row slices in the kernel.
# -----------------------------------------------------------------------------
def pack_params(params, state_dim, action_dim, hidden_dim):
    (aw1, ab1, aw2, ab2, aw3, ab3,
     cw1, cb1, cw2, cb2, cw3, cb3, action_std) = params
    S, A, H = state_dim, action_dim, hidden_dim
    FH = 2 * H  # fused hidden width (actor | critic)
    P = LANES
    assert FH <= P and A + S + 1 <= P
    f32 = jnp.float32

    # Layer 1: input lanes [A:A+S) carry the state; actor hidden -> lanes [0:H),
    # critic hidden -> [H:2H). All other rows (action / corr lanes) are zero.
    w1f = (jnp.zeros((P, P), f32)
           .at[A:A + S, 0:H].set(aw1)
           .at[A:A + S, H:FH].set(cw1))
    # Layer 2: block diagonal.
    w2f = (jnp.zeros((P, P), f32)
           .at[0:H, 0:H].set(aw2)
           .at[H:FH, H:FH].set(cw2))
    # Layer 3: actor pre-tanh -> lanes [0:A), critic value -> lane A.
    w3f = (jnp.zeros((P, P), f32)
           .at[0:H, 0:A].set(aw3)
           .at[H:FH, A:A + 1].set(cw3))
    # Selector for the epilogue matmul:
    #   col0 = sum(per-lane Normal log_prob over action lanes) - corr_sum (lane A+S)
    #   col1 = critic value (lane A)
    sel = (jnp.zeros((P, P), f32)
           .at[0:A, 0].set(1.0)
           .at[A + S, 0].set(-1.0)
           .at[A, 1].set(1.0))

    b1f = jnp.zeros((1, P), f32).at[0, 0:H].set(ab1).at[0, H:FH].set(cb1)
    b2f = jnp.zeros((1, P), f32).at[0, 0:H].set(ab2).at[0, H:FH].set(cb2)
    b3f = jnp.zeros((1, P), f32).at[0, 0:A].set(ab3).at[0, A].set(cb3[0])

    std = action_std.astype(f32)
    log_std = jnp.log(std)
    nhiv = jnp.zeros((1, P), f32).at[0, 0:A].set(-0.5 / (std * std))
    cnst = jnp.zeros((1, P), f32).at[0, 0:A].set(-log_std - LOG_SQRT_2PI)
    mask_val = jnp.zeros((1, P), f32).at[0, A].set(1.0)        # picks z[:, A] (value)
    mask_corr = jnp.zeros((1, P), f32).at[0, A + S].set(1.0)   # picks xin[:, A+S] (corr_sum)
    # dist.entropy().mean() is batch- and activation-independent:
    ent_val = 0.5 + LOG_SQRT_2PI + jnp.mean(log_std)
    ent_row = jnp.zeros((1, P), f32).at[0, 2].set(ent_val)

    layout = {}
    r = 0
    layout["w1"] = r; r += P
    layout["w2"] = r; r += P
    layout["w3"] = r; r += P
    layout["sel"] = r; r += P
    layout["b1"] = r; r += 1
    layout["b2"] = r; r += 1
    layout["b3"] = r; r += 1
    layout["nhiv"] = r; r += 1
    layout["const"] = r; r += 1
    layout["mval"] = r; r += 1
    layout["mcorr"] = r; r += 1
    layout["ent"] = r; r += 1
    total = _round_up(r, 8)

    packed = jnp.concatenate(
        [w1f, w2f, w3f, sel, b1f, b2f, b3f, nhiv, cnst, mask_val, mask_corr,
         ent_row, jnp.zeros((total - r, P), f32)], axis=0)
    return packed, layout


# -----------------------------------------------------------------------------
# Kernel
# -----------------------------------------------------------------------------
def _make_kernel(layout):
    P = LANES
    rW1, rW2, rW3, rSEL = layout["w1"], layout["w2"], layout["w3"], layout["sel"]
    rB1, rB2, rB3 = layout["b1"], layout["b2"], layout["b3"]
    rNHIV, rCONST = layout["nhiv"], layout["const"]
    rMV, rMC, rENT = layout["mval"], layout["mcorr"], layout["ent"]

    def kernel(xin_ref, p_ref, out_ref):
        x = xin_ref[...]                                   # [bt, 128] f32

        # Fused actor|critic MLP: three lane-dense [bt,128]x[128,128] MXU pushes.
        h = jnp.maximum(
            jnp.dot(x, p_ref[rW1:rW1 + P, :], preferred_element_type=jnp.float32)
            + p_ref[rB1:rB1 + 1, :], 0.0)
        h = jnp.maximum(
            jnp.dot(h, p_ref[rW2:rW2 + P, :], preferred_element_type=jnp.float32)
            + p_ref[rB2:rB2 + 1, :], 0.0)
        z = (jnp.dot(h, p_ref[rW3:rW3 + P, :], preferred_element_type=jnp.float32)
             + p_ref[rB3:rB3 + 1, :])          # lanes [0:A)=pre-tanh mean, lane A=value

        mean = jnp.tanh(z)                     # single remaining EUP pass
        diff = x - mean
        # Per-lane Normal log_prob on action lanes, exactly zero elsewhere
        # (nhiv / const rows are zero outside [0:A)).
        gauss = diff * diff * p_ref[rNHIV:rNHIV + 1, :] + p_ref[rCONST:rCONST + 1, :]
        # y: action lanes -> gauss, lane A -> value (from z), lane A+S -> corr_sum (from x).
        y = gauss + z * p_ref[rMV:rMV + 1, :] + x * p_ref[rMC:rMC + 1, :]
        # Selector-matmul epilogue: col0 = logp, col1 = value, col2 = entropy, rest 0.
        out = (jnp.dot(y, p_ref[rSEL:rSEL + P, :], preferred_element_type=jnp.float32)
               + p_ref[rENT:rENT + 1, :])
        out_ref[...] = out                     # single unmasked lane-dense store

    return kernel


# -----------------------------------------------------------------------------
# Wrapper
# -----------------------------------------------------------------------------
def actor_critic_evaluate(state, action, packed, layout, state_dim, action_dim):
    B = state.shape[0]
    S, A, P = state_dim, action_dim, LANES
    b_pad, bt = _choose_tiling(B)

    # One lane-dense input slab: lanes [0:A)=action, [A:A+S)=state,
    # lane A+S = precomputed tanh-squash correction sum (action-only, so it is
    # hoisted into the wrapper op that already materializes this [B,128] buffer).
    act = action.astype(jnp.float32)
    t = jnp.tanh(act)
    corr_sum = jnp.sum(jnp.log(ACTION_SCALE * (1.0 - t * t) + 1e-6), axis=1)
    xin = (jnp.zeros((b_pad, P), jnp.float32)
           .at[:B, 0:A].set(act)
           .at[:B, A:A + S].set(state.astype(jnp.float32))
           .at[:B, A + S].set(corr_sum))

    kernel = _make_kernel(layout)
    out = pl.pallas_call(
        kernel,
        out_shape=jax.ShapeDtypeStruct((b_pad, P), jnp.float32),
        grid=(b_pad // bt,),
        in_specs=[
            pl.BlockSpec((bt, P), lambda i: (i, 0)),
            pl.BlockSpec(packed.shape, lambda i: (0, 0)),   # weights resident
        ],
        out_specs=pl.BlockSpec((bt, P), lambda i: (i, 0)),
        compiler_params=pltpu.CompilerParams(
            dimension_semantics=("parallel",)),
    )(xin, packed)

    action_logprobs = out[:B, 0:1]
    state_value = out[:B, 1:2]
    dist_entropy = out[0, 2]
    return action_logprobs, state_value, dist_entropy


# -----------------------------------------------------------------------------
# Pure-JAX reference (mirrors the PyTorch evaluate()) for the sanity check.
# -----------------------------------------------------------------------------
def evaluate_ref(state, action, params):
    (aw1, ab1, aw2, ab2, aw3, ab3,
     cw1, cb1, cw2, cb2, cw3, cb3, std) = params
    a = jnp.maximum(state @ aw1 + ab1, 0.0)
    a = jnp.maximum(a @ aw2 + ab2, 0.0)
    mean = jnp.tanh(a @ aw3 + ab3)
    log_std = jnp.log(std)
    var = std * std
    logp = -((action - mean) ** 2) / (2.0 * var) - log_std - LOG_SQRT_2PI
    logp = logp - jnp.log(ACTION_SCALE * (1.0 - jnp.tanh(action) ** 2) + 1e-6)
    logp = jnp.sum(logp, axis=1, keepdims=True)
    ent = jnp.mean(jnp.broadcast_to(0.5 + LOG_SQRT_2PI + log_std, mean.shape))
    c = jnp.maximum(state @ cw1 + cb1, 0.0)
    c = jnp.maximum(c @ cw2 + cb2, 0.0)
    value = c @ cw3 + cb3
    return logp, value, ent


if __name__ == "__main__":
    key = jax.random.PRNGKey(0)
    k_params = jax.random.fold_in(key, 0)
    params = init_params(k_params, STATE_DIM, ACTION_DIM, HIDDEN_DIM)
    packed, layout = pack_params(params, STATE_DIM, ACTION_DIM, HIDDEN_DIM)

    # First case: the canonical small batch. Second case: ragged batch that
    # exercises the padding path and the >=2-step grid (megacore sharding).
    for batch in (BATCH, 24):
        ks, ka = jax.random.split(jax.random.fold_in(key, batch))
        state = jax.random.normal(ks, (batch, STATE_DIM), jnp.float32)
        action = jax.random.normal(ka, (batch, ACTION_DIM), jnp.float32)

        logp, value, entropy = actor_critic_evaluate(
            state, action, packed, layout, STATE_DIM, ACTION_DIM)
        jax.block_until_ready((logp, value, entropy))

        assert logp.shape == (batch, 1)
        assert value.shape == (batch, 1)
        assert entropy.shape == ()
        assert bool(jnp.all(jnp.isfinite(logp))) and bool(jnp.all(jnp.isfinite(value)))

        # Cross-check against the pure-JAX reference (all-f32 path -> tight tol).
        logp_r, value_r, ent_r = evaluate_ref(state, action, params)
        assert bool(jnp.allclose(logp, logp_r, rtol=1e-3, atol=1e-3))
        assert bool(jnp.allclose(value, value_r, rtol=1e-3, atol=1e-3))
        assert bool(jnp.allclose(entropy, ent_r, rtol=1e-3, atol=1e-3))

    print("KERNEL_OK")
</pallas_src>

<mosaic_0001>
module attributes {stable_mosaic.version = 11 : i64} {
  func.func @kernel(%arg0: i32, %arg1: memref<8x128xf32, #tpu.memory_space<vmem>>, %arg2: memref<520x128xf32, #tpu.memory_space<vmem>>, %arg3: memref<8x128xf32, #tpu.memory_space<vmem>>) attributes {dimension_semantics = [#tpu.dimension_semantics<parallel>], iteration_bounds = array<i64: 1>, scalar_prefetch = 0 : i64, scratch_operands = 0 : i64, tpu.core_type = #tpu.core_type<tc>, window_params = [{transform_indices = @transform_0, window_bounds = array<i64: 8, 128>}, {pipeline_mode = #tpu.pipeline_mode<synchronous>, transform_indices = @transform_1, window_bounds = array<i64: 520, 128>}, {transform_indices = @transform_2, window_bounds = array<i64: 8, 128>}]} {
    %c0 = arith.constant 0 : index
    %c0_0 = arith.constant 0 : index
    %0 = vector.load %arg1[%c0, %c0_0] : memref<8x128xf32, #tpu.memory_space<vmem>>, vector<8x128xf32>
    %c0_1 = arith.constant 0 : index
    %c0_2 = arith.constant 0 : index
    %1 = vector.load %arg2[%c0_1, %c0_2] : memref<520x128xf32, #tpu.memory_space<vmem>>, vector<128x128xf32>
    %cst = arith.constant dense<0.000000e+00> : vector<8x128xf32>
    %2 = tpu.matmul %0, %1, %cst {dimension_numbers = #tpu.dot_dimension_numbers<[1], [0], [0], [1], [0, 0, 1, 1], [], []>} : vector<8x128xf32>, vector<128x128xf32>, vector<8x128xf32> -> vector<8x128xf32>
    %c512 = arith.constant 512 : index
    %c0_3 = arith.constant 0 : index
    %3 = vector.load %arg2[%c512, %c0_3] : memref<520x128xf32, #tpu.memory_space<vmem>>, vector<1x128xf32>
    %4 = vector.broadcast %3 : vector<1x128xf32> to vector<8x128xf32>
    %5 = arith.addf %2, %4 : vector<8x128xf32>
    %cst_4 = arith.constant 0.000000e+00 : f32
    %6 = vector.broadcast %cst_4 : f32 to vector<8x128xf32>
    %7 = arith.maximumf %5, %6 : vector<8x128xf32>
    %c128 = arith.constant 128 : index
    %c0_5 = arith.constant 0 : index
    %8 = vector.load %arg2[%c128, %c0_5] : memref<520x128xf32, #tpu.memory_space<vmem>>, vector<128x128xf32>
    %cst_6 = arith.constant dense<0.000000e+00> : vector<8x128xf32>
    %9 = tpu.matmul %7, %8, %cst_6 {dimension_numbers = #tpu.dot_dimension_numbers<[1], [0], [0], [1], [0, 0, 1, 1], [], []>} : vector<8x128xf32>, vector<128x128xf32>, vector<8x128xf32> -> vector<8x128xf32>
    %c513 = arith.constant 513 : index
    %c0_7 = arith.constant 0 : index
    %10 = vector.load %arg2[%c513, %c0_7] : memref<520x128xf32, #tpu.memory_space<vmem>>, vector<1x128xf32>
    %11 = vector.broadcast %10 : vector<1x128xf32> to vector<8x128xf32>
    %12 = arith.addf %9, %11 : vector<8x128xf32>
    %cst_8 = arith.constant 0.000000e+00 : f32
    %13 = vector.broadcast %cst_8 : f32 to vector<8x128xf32>
    %14 = arith.maximumf %12, %13 : vector<8x128xf32>
    %c256 = arith.constant 256 : index
    %c0_9 = arith.constant 0 : index
    %15 = vector.load %arg2[%c256, %c0_9] : memref<520x128xf32, #tpu.memory_space<vmem>>, vector<128x128xf32>
    %cst_10 = arith.constant dense<0.000000e+00> : vector<8x128xf32>
    %16 = tpu.matmul %14, %15, %cst_10 {dimension_numbers = #tpu.dot_dimension_numbers<[1], [0], [0], [1], [0, 0, 1, 1], [], []>} : vector<8x128xf32>, vector<128x128xf32>, vector<8x128xf32> -> vector<8x128xf32>
    %c514 = arith.constant 514 : index
    %c0_11 = arith.constant 0 : index
    %17 = vector.load %arg2[%c514, %c0_11] : memref<520x128xf32, #tpu.memory_space<vmem>>, vector<1x128xf32>
    %18 = vector.broadcast %17 : vector<1x128xf32> to vector<8x128xf32>
    %19 = arith.addf %16, %18 : vector<8x128xf32>
    %20 = math.tanh %19 : vector<8x128xf32>
    %21 = arith.subf %0, %20 : vector<8x128xf32>
    %22 = arith.mulf %21, %21 : vector<8x128xf32>
    %c515 = arith.constant 515 : index
    %c0_12 = arith.constant 0 : index
    %23 = vector.load %arg2[%c515, %c0_12] : memref<520x128xf32, #tpu.memory_space<vmem>>, vector<1x128xf32>
    %24 = vector.broadcast %23 : vector<1x128xf32> to vector<8x128xf32>
    %25 = arith.mulf %22, %24 : vector<8x128xf32>
    %c516 = arith.constant 516 : index
    %c0_13 = arith.constant 0 : index
    %26 = vector.load %arg2[%c516, %c0_13] : memref<520x128xf32, #tpu.memory_space<vmem>>, vector<1x128xf32>
    %27 = vector.broadcast %26 : vector<1x128xf32> to vector<8x128xf32>
    %28 = arith.addf %25, %27 : vector<8x128xf32>
    %c517 = arith.constant 517 : index
    %c0_14 = arith.constant 0 : index
    %29 = vector.load %arg2[%c517, %c0_14] : memref<520x128xf32, #tpu.memory_space<vmem>>, vector<1x128xf32>
    %30 = vector.broadcast %29 : vector<1x128xf32> to vector<8x128xf32>
    %31 = arith.mulf %19, %30 : vector<8x128xf32>
    %32 = arith.addf %28, %31 : vector<8x128xf32>
    %c518 = arith.constant 518 : index
    %c0_15 = arith.constant 0 : index
    %33 = vector.load %arg2[%c518, %c0_15] : memref<520x128xf32, #tpu.memory_space<vmem>>, vector<1x128xf32>
    %34 = vector.broadcast %33 : vector<1x128xf32> to vector<8x128xf32>
    %35 = arith.mulf %0, %34 : vector<8x128xf32>
    %36 = arith.addf %32, %35 : vector<8x128xf32>
    %c384 = arith.constant 384 : index
    %c0_16 = arith.constant 0 : index
    %37 = vector.load %arg2[%c384, %c0_16] : memref<520x128xf32, #tpu.memory_space<vmem>>, vector<128x128xf32>
    %cst_17 = arith.constant dense<0.000000e+00> : vector<8x128xf32>
    %38 = tpu.matmul %36, %37, %cst_17 {dimension_numbers = #tpu.dot_dimension_numbers<[1], [0], [0], [1], [0, 0, 1, 1], [], []>} : vector<8x128xf32>, vector<128x128xf32>, vector<8x128xf32> -> vector<8x128xf32>
    %c519 = arith.constant 519 : index
    %c0_18 = arith.constant 0 : index
    %39 = vector.load %arg2[%c519, %c0_18] : memref<520x128xf32, #tpu.memory_space<vmem>>, vector<1x128xf32>
    %40 = vector.broadcast %39 : vector<1x128xf32> to vector<8x128xf32>
    %41 = arith.addf %38, %40 : vector<8x128xf32>
    %c0_19 = arith.constant 0 : index
    %c0_20 = arith.constant 0 : index
    %42 = vector.load %arg3[%c0_19, %c0_20] : memref<8x128xf32, #tpu.memory_space<vmem>>, vector<8x128xf32>
    tpu.vector_store %arg3[%c0_19, %c0_20], %41 {strides = array<i32>} : memref<8x128xf32, #tpu.memory_space<vmem>>, vector<8x128xf32>,
    return
  }
  func.func @transform_0(%arg0: i32) -> (i32, i32) {
    %c0_i32 = arith.constant 0 : i32
    %c0_i32_0 = arith.constant 0 : i32
    return %arg0, %c0_i32 : i32, i32
  }
  func.func @transform_1(%arg0: i32) -> (i32, i32) {
    %c0_i32 = arith.constant 0 : i32
    %c0_i32_0 = arith.constant 0 : i32
    %c0_i32_1 = arith.constant 0 : i32
    return %c0_i32, %c0_i32_0 : i32, i32
  }
  func.func @transform_2(%arg0: i32) -> (i32, i32) {
    %c0_i32 = arith.constant 0 : i32
    %c0_i32_0 = arith.constant 0 : i32
    return %arg0, %c0_i32 : i32, i32
  }
}

</mosaic_0001>

<bundles_post_ra>
// kernel: tpu_custom_call.1
= control target key start
LH: loop header
LB: loop body
LE: loop exit
PB: predicated region body
PF: predicated region fallthrough
CT: control target
= control target key end

     0   :  { %7 = vsyncpa [#allocation3], 0  ;;  %s360_s0 = inlined_call_operand.hbm [shape: f32[8,128], index: 0, kind: input, shape index: {}]   ;;  %s361_s1 = inlined_call_operand.hbm [shape: f32[520,128], index: 1, kind: input, shape index: {}]   ;;  %s362_s2 = inlined_call_operand.hbm [shape: f32[8,128], index: 2, kind: output, shape index: {}]  }
   0x1   :  { %8 = vsyncpa [#allocation6], 0 }
   0x2   :  { %9 = vsyncpa [#allocation4], 0  ;;  %s15_s11 = sshll.u32 %s360_s0, 4  ;;  %s326_s12 = smov [#allocation2]   ;;  %s16_s11 = int_to_ptr.hbm [resolvable:$true] %s15_s11 }
   0x3   :  { %s17_s13 = sshll.u32 %s326_s12, 4  ;;  %s25_s16 = sshll.u32 %s361_s1, 4  ;;  %s18_s13 = int_to_ptr.vmem [resolvable:$true] %s17_s13  ;;  %s26_s16 = int_to_ptr.hbm [resolvable:$true] %s25_s16 }
   0x4   :  { %20 = dma.hbm_to_vmem [thread:$0]  %s16_s11, 128, %s18_s13, [#allocation3]  }
   0x5   :  { %s327_s17 = smov [#allocation5]   ;;  %s328_s19 = smov 128  }
   0x6   :  { %s27_s18 = sshll.u32 %s327_s17, 4  ;;  %s329_s20 = smov 8   ;;  %s28_s18 = int_to_ptr.vmem [resolvable:$true] %s27_s18 }
   0x7   :  { %33 = dma.hbm_to_vmem [thread:$0]  %s26_s16, 8320, %s28_s18, [#allocation6], %s328_s19, %s328_s19, %s329_s20  }
   0x8   :  { %320 = dma.done.wait [#allocation3], 128  }
   0x9   :  { %321 = vsyncadd [#allocation3], 4294967168 }
   0xa   :  { %322 = dma.done.wait [#allocation6], 8320  }
   0xb   :  { %323 = vsyncadd [#allocation6], 4294958976  ;;  %v58_v0 = vld [vmem:[#allocation5 + $0x78] sm:$0xff]  ;;  %v57_v1 = vld [vmem:[#allocation5 + $0x70] sm:$0xff]  ;;  %s330_s0 = smov [#allocation7]   ;;  %s222_s23 = sshll.u32 %s362_s2, 4  ;;  %s223_s23 = int_to_ptr.hbm [resolvable:$true] %s222_s23 }
   0xc   :  { %61 = vmatpush.msra.mxu0 %v58_v0  ;;  %v56_v2 = vld [vmem:[#allocation5 + $0x68] sm:$0xff]  ;;  %v55_v3 = vld [vmem:[#allocation5 + $0x60] sm:$0xff]  ;;  %v97_v4 = vld [vmem:[#allocation5 + $0xf8] sm:$0xff]  ;;  %s220_s1 = sshll.u32 %s330_s0, 4  ;;  %s221_s1 = int_to_ptr.vmem [resolvable:$true] %s220_s1 }
   0xd   :  { %v54_v5 = vld [vmem:[#allocation5 + $0x58] sm:$0xff]  ;;  %100 = vmatpush.msra.mxu1 %v97_v4  ;;  %v96_v6 = vld [vmem:[#allocation5 + $0xf0] sm:$0xff]  ;;  %v95_v7 = vld [vmem:[#allocation5 + $0xe8] sm:$0xff] }
   0xe   :  { %62 = vmatpush.msra.mxu0 %v57_v1  ;;  %v53_v8 = vld [vmem:[#allocation5 + $0x50] sm:$0xff]  ;;  %v52_v9 = vld [vmem:[#allocation5 + $0x48] sm:$0xff]  ;;  %v94_v10 = vld [vmem:[#allocation5 + $0xe0] sm:$0xff] }
   0xf   :  { %101 = vmatpush.msra.mxu1 %v96_v6  ;;  %v51_v11 = vld [vmem:[#allocation5 + $0x40] sm:$0xff]  ;;  %v93_v12 = vld [vmem:[#allocation5 + $0xd8] sm:$0xff]  ;;  %v92_v13 = vld [vmem:[#allocation5 + $0xd0] sm:$0xff] }
  0x10   :  { %63 = vmatpush.msra.mxu0 %v56_v2  ;;  %v50_v14 = vld [vmem:[#allocation5 + $0x38] sm:$0xff]  ;;  %v91_v15 = vld [vmem:[#allocation5 + $0xc8] sm:$0xff]  ;;  %v49_v16 = vld [vmem:[#allocation5 + $0x30] sm:$0xff] }
  0x11   :  { %102 = vmatpush.msra.mxu1 %v95_v7  ;;  %v90_v17 = vld [vmem:[#allocation5 + $0xc0] sm:$0xff]  ;;  %v48_v18 = vld [vmem:[#allocation5 + $0x28] sm:$0xff]  ;;  %v89_v19 = vld [vmem:[#allocation5 + $0xb8] sm:$0xff] }
  0x12   :  { %64 = vmatpush.msra.mxu0 %v55_v3  ;;  %v47_v20 = vld [vmem:[#allocation5 + $0x20] sm:$0xff]  ;;  %v88_v21 = vld [vmem:[#allocation5 + $0xb0] sm:$0xff]  ;;  %v46_v22 = vld [vmem:[#allocation5 + $0x18] sm:$0xff] }
  0x13   :  { %103 = vmatpush.msra.mxu1 %v94_v10  ;;  %v87_v23 = vld [vmem:[#allocation5 + $0xa8] sm:$0xff]  ;;  %v45_v24 = vld [vmem:[#allocation5 + $0x10] sm:$0xff]  ;;  %v86_v25 = vld [vmem:[#allocation5 + $0xa0] sm:$0xff] }
  0x14   :  { %65 = vmatpush.msra.mxu0 %v54_v5  ;;  %v44_v26 = vld [vmem:[#allocation5 + $0x8] sm:$0xff]  ;;  %v85_v27 = vld [vmem:[#allocation5 + $0x98] sm:$0xff]  ;;  %v43_v28 = vld [vmem:[#allocation5] sm:$0xff] }
  0x15   :  { %104 = vmatpush.msra.mxu1 %v93_v12  ;;  %v352_v29 = vld [vmem:[#allocation2] sm:$0xff]  ;;  %v84_v30 = vld [vmem:[#allocation5 + $0x90] sm:$0xff]  ;;  %v83_v31 = vld [vmem:[#allocation5 + $0x88] sm:$0xff] }
  0x16   :  { %66 = vmatpush.msra.mxu0 %v53_v8  ;;  %v82_v32 = vld [vmem:[#allocation5 + $0x80] sm:$0xff]  ;;  %v136_v33 = vld [vmem:[#allocation5 + $0x178] sm:$0xff]  ;;  %v135_v34 = vld [vmem:[#allocation5 + $0x170] sm:$0xff] }
  0x17   :  { %105 = vmatpush.msra.mxu1 %v92_v13  ;;  %139 = vmatpush.msra.mxu2 %v136_v33  ;;  %v134_v35 = vld [vmem:[#allocation5 + $0x168] sm:$0xff]  ;;  %v133_v36 = vld [vmem:[#allocation5 + $0x160] sm:$0xff]  ;;  %v132_v37 = vld [vmem:[#allocation5 + $0x158] sm:$0xff] }
  0x18   :  { %67 = vmatpush.msra.mxu0 %v52_v9  ;;  %v131_v38 = vld [vmem:[#allocation5 + $0x150] sm:$0xff]  ;;  %v130_v39 = vld [vmem:[#allocation5 + $0x148] sm:$0xff]  ;;  %v129_v40 = vld [vmem:[#allocation5 + $0x140] sm:$0xff] }
  0x19   :  { %106 = vmatpush.msra.mxu1 %v91_v15  ;;  %140 = vmatpush.msra.mxu2 %v135_v34  ;;  %v128_v41 = vld [vmem:[#allocation5 + $0x138] sm:$0xff]  ;;  %v127_v42 = vld [vmem:[#allocation5 + $0x130] sm:$0xff]  ;;  %v126_v43 = vld [vmem:[#allocation5 + $0x128] sm:$0xff] }
  0x1a   :  { %68 = vmatpush.msra.mxu0 %v51_v11  ;;  %v125_v44 = vld [vmem:[#allocation5 + $0x120] sm:$0xff]  ;;  %v124_v45 = vld [vmem:[#allocation5 + $0x118] sm:$0xff]  ;;  %v123_v50 = vld [vmem:[#allocation5 + $0x110] sm:$0xff] }
  0x1b   :  { %107 = vmatpush.msra.mxu1 %v90_v17  ;;  %141 = vmatpush.msra.mxu2 %v134_v35  ;;  %v238_v46 = vld [vmem:[#allocation5 + $0x200] ss:$0 sm:$0xff]  ;;  %v122_v51 = vld [vmem:[#allocation5 + $0x108] sm:$0xff]  ;;  %v191_v53 = vld [vmem:[#allocation5 + $0x1f8] sm:$0xff] }
  0x1c   :  { %69 = vmatpush.msra.mxu0 %v50_v14  ;;  %v121_v52 = vld [vmem:[#allocation5 + $0x100] sm:$0xff]  ;;  %v190_v54 = vld [vmem:[#allocation5 + $0x1f0] sm:$0xff]  ;;  %194 = vmatpush.msra.mxu3 %v191_v53  ;;  %v189_v55 = vld [vmem:[#allocation5 + $0x1e8] sm:$0xff] }
  0x1d   :  { %108 = vmatpush.msra.mxu1 %v89_v19  ;;  %142 = vmatpush.msra.mxu2 %v133_v36  ;;  %v188_v56 = vld [vmem:[#allocation5 + $0x1e0] sm:$0xff]  ;;  %v187_v57 = vld [vmem:[#allocation5 + $0x1d8] sm:$0xff]  ;;  %v186_v62 = vld [vmem:[#allocation5 + $0x1d0] sm:$0xff] }
  0x1e   :  { %70 = vmatpush.msra.mxu0 %v49_v16  ;;  %195 = vmatpush.msra.mxu3 %v190_v54  ;;  %v239_v58 = vld [vmem:[#allocation5 + $0x201] ss:$0 sm:$0xff]  ;;  %v185_v63 = vld [vmem:[#allocation5 + $0x1c8] sm:$0xff]  ;;  %v183_v1 = vld [vmem:[#allocation5 + $0x1b8] sm:$0xff] }
  0x1f   :  { %109 = vmatpush.msra.mxu1 %v88_v21  ;;  %143 = vmatpush.msra.mxu2 %v132_v37  ;;  %v184_v0 = vld [vmem:[#allocation5 + $0x1c0] sm:$0xff]  ;;  %v182_v2 = vld [vmem:[#allocation5 + $0x1b0] sm:$0xff]  ;;  %v181_v3 = vld [vmem:[#allocation5 + $0x1a8] sm:$0xff] }
  0x20   :  { %71 = vmatpush.msra.mxu0 %v48_v18  ;;  %196 = vmatpush.msra.mxu3 %v189_v55  ;;  %v180_v4 = vld [vmem:[#allocation5 + $0x1a0] sm:$0xff]  ;;  %v179_v5 = vld [vmem:[#allocation5 + $0x198] sm:$0xff]  ;;  %v178_v6 = vld [vmem:[#allocation5 + $0x190] sm:$0xff] }
  0x21   :  { %110 = vmatpush.msra.mxu1 %v87_v23  ;;  %144 = vmatpush.msra.mxu2 %v131_v38  ;;  %v177_v7 = vld [vmem:[#allocation5 + $0x188] sm:$0xff]  ;;  %v176_v8 = vld [vmem:[#allocation5 + $0x180] sm:$0xff] }
  0x22   :  { %72 = vmatpush.msra.mxu0 %v47_v20  ;;  %197 = vmatpush.msra.mxu3 %v188_v56  ;;  %v240_v9 = vld [vmem:[#allocation5 + $0x202] ss:$0 sm:$0xff]  ;;  %v242_v14 = vld [vmem:[#allocation5 + $0x203] ss:$0 sm:$0xff]  ;;  %v241_v15 = vld [vmem:[#allocation5 + $0x205] ss:$0 sm:$0xff] }
  0x23   :  { %111 = vmatpush.msra.mxu1 %v86_v25  ;;  %145 = vmatpush.msra.mxu2 %v130_v39  ;;  %v243_v17 = vld [vmem:[#allocation5 + $0x204] ss:$0 sm:$0xff]  ;;  %v244_v18 = vld [vmem:[#allocation5 + $0x206] ss:$0 sm:$0xff]  ;;  %v245_v25 = vld [vmem:[#allocation5 + $0x207] ss:$0 sm:$0xff] }
  0x24   :  { %73 = vmatpush.msra.mxu0 %v46_v22  ;;  %198 = vmatpush.msra.mxu3 %v187_v57  ;;  %v174_v22 = vmul.f32 %v244_v18, %v352_v29 }
  0x25   :  { %112 = vmatpush.msra.mxu1 %v85_v27  ;;  %146 = vmatpush.msra.mxu2 %v129_v40 }
  0x26   :  { %74 = vmatpush.msra.mxu0 %v45_v24  ;;  %199 = vmatpush.msra.mxu3 %v186_v62 }
  0x27   :  { %113 = vmatpush.msra.mxu1 %v84_v30  ;;  %147 = vmatpush.msra.mxu2 %v128_v41 }
  0x28   :  { %75 = vmatpush.msra.mxu0 %v44_v26  ;;  %200 = vmatpush.msra.mxu3 %v185_v63 }
  0x29   :  { %114 = vmatpush.msra.mxu1 %v83_v31  ;;  %148 = vmatpush.msra.mxu2 %v127_v42 }
  0x2a   :  { %76 = vmatpush.msra.mxu0 %v43_v28  ;;  %201 = vmatpush.msra.mxu3 %v184_v0 }
  0x2b   :  { %77 = vmatmul.f32.vlgmr.msra.gmra.mxu0 %v352_v29  ;;  %115 = vmatpush.msra.mxu1 %v82_v32 }
  0x2c   :  { %149 = vmatpush.msra.mxu2 %v126_v43  ;;  %202 = vmatpush.msra.mxu3 %v183_v1 }
  0x2e   :  { %150 = vmatpush.msra.mxu2 %v125_v44  ;;  %203 = vmatpush.msra.mxu3 %v182_v2 }
  0x30   :  { %151 = vmatpush.msra.mxu2 %v124_v45  ;;  %204 = vmatpush.msra.mxu3 %v181_v3 }
  0x32   :  { %152 = vmatpush.msra.mxu2 %v123_v50  ;;  %205 = vmatpush.msra.mxu3 %v180_v4 }
  0x34   :  { %153 = vmatpush.msra.mxu2 %v122_v51  ;;  %206 = vmatpush.msra.mxu3 %v179_v5 }
  0x36   :  { %154 = vmatpush.msra.mxu2 %v121_v52  ;;  %207 = vmatpush.msra.mxu3 %v178_v6 }
  0x38   :  { %208 = vmatpush.msra.mxu3 %v177_v7 }
  0x3a   :  { %209 = vmatpush.msra.mxu3 %v176_v8 }
  0xa8   :  { %v78_v47 = vpop.f32.mrf.mxu0 }
  0xa9   :  { %v79_v48 = vadd.f32 %v238_v46, %v78_v47 }
  0xab   :  { %v81_v49 = vmax.f32 %v79_v48, 0.0 }
  0xad   :  { %116 = vmatmul.f32.vlgmr.msra.gmra.mxu1 %v81_v49 }
 0x12a   :  { %v117_v59 = vpop.f32.mrf.mxu1 }
 0x12b   :  { %v118_v60 = vadd.f32 %v239_v58, %v117_v59 }
 0x12d   :  { %v120_v61 = vmax.f32 %v118_v60, 0.0 }
 0x12f   :  { %155 = vmatmul.f32.vlgmr.msra.gmra.mxu2 %v120_v61 }
 0x1b2   :  { %v156_v10 = vpop.f32.mrf.mxu2 }
 0x1b3   :  { %v157_v11 = vadd.f32 %v240_v9, %v156_v10 }
 0x1b5   :  { %246 = vtanh.f32 %v157_v11  ;;  %v170_v20 = vmul.f32 %v241_v15, %v157_v11 }
 0x1bb   :  { %v247_v12 = vpop.eup %246 }
 0x1bc   :  { %v160_v13 = vsub.f32 %v352_v29, %v247_v12 }
 0x1be   :  { %v161_v16 = vmul.f32 %v160_v13, %v160_v13 }
 0x1c0   :  { %v164_v19 = vmul.f32 %v242_v14, %v161_v16 }
 0x1c2   :  { %v167_v21 = vadd.f32 %v243_v17, %v164_v19 }
 0x1c4   :  { %v171_v23 = vadd.f32 %v170_v20, %v167_v21 }
 0x1c6   :  { %v175_v24 = vadd.f32 %v174_v22, %v171_v23 }
 0x1c8   :  { %210 = vmatmul.f32.vlgmr.msra.gmra.mxu3 %v175_v24 }
 0x24b   :  { %v211_v26 = vpop.f32.mrf.mxu3 }
 0x24c   :  { %v212_v27 = vadd.f32 %v245_v25, %v211_v26 }
 0x24e   :  { %214 = vst [vmem:[#allocation7] sm:$0xff] %v212_v27 }
 0x24f   :  { %225 = dma.vmem_to_hbm [thread:$0]  %s221_s1, 128, %s223_s23, [#allocation4]  }
 0x250   :  { %324 = dma.done.wait [#allocation4], 128  }
 0x251   :  { %325 = vsyncadd [#allocation4], 4294967168 }
 0x252   :  { %230 = vsyncpa [#allocation3], 1 }
 0x253   :  { %231 = vsyncpa [#allocation6], 1 }
 0x254   :  { %232 = vsyncpa [#allocation4], 1 }

</bundles_post_ra>
